<compile_context>
chip_gen: v5e
topology: v5e:2x2
jax: 0.10.0
libtpu: 0.0.40
codegen_flags: <defaults>
</compile_context>

<pallas_src>
import math

import jax
import jax.numpy as jnp
from jax.experimental import pallas as pl
from jax.experimental.pallas import tpu as pltpu

# Per-array block budget.  Double-buffered x 2 arrays (in + out) => ~8 MiB of
# pipeline VMEM: safe on v5e/v6e (128 MiB) and v7x (64 MiB physical / 32 MiB
# scoped), and large enough that per-grid-step overhead is <10% of transfer.
_BLOCK_BUDGET_BYTES = 2 << 20

# Below this total size, skip Pallas entirely (launch overhead dominates).
_SMALL_INPUT_BYTES = 256 << 10

# Explicit scoped-VMEM limit with headroom under v7x's 32 MiB default.
_VMEM_LIMIT_BYTES = 28 << 20


def _zero_ablate_kernel(x_ref, o_ref):
    # Elementwise multiply by a same-dtype zero on the VPU.
    o_ref[...] = x_ref[...] * jnp.zeros((), o_ref.dtype)


def _round_down(x, m):
    return (x // m) * m


def _round_up(x, m):
    return ((x + m - 1) // m) * m


def _sublane_step(dtype):
    # Sub-32-bit dtypes pack along sublanes: f32 -> 8, bf16 -> 16, i8/fp8 -> 32.
    packing = max(1, 4 // jnp.dtype(dtype).itemsize)
    return 8 * packing


def _pallas_zero(x):
    shape = x.shape
    dtype = x.dtype
    ndim = x.ndim
    itemsize = jnp.dtype(dtype).itemsize
    budget_elems = max(_BLOCK_BUDGET_BYTES // itemsize, 1)

    if ndim == 1:
        (length,) = shape
        t = min(length, max(128, _round_down(budget_elems, 128)))
        if pl.cdiv(length, t) == 1 and length > 128:
            # >= 2 grid steps so v7x's second TensorCore gets work.
            t = min(length, _round_up(pl.cdiv(length, 2), 128))
        grid = (pl.cdiv(length, t),)
        block_shape = (t,)
        index_map = lambda i: (i,)

    elif ndim == 2:
        d0, d1 = shape
        step = _sublane_step(dtype)
        t0 = max(1, budget_elems // max(d1, 1))
        if t0 >= d0:
            t0 = d0
        else:
            # Sublane block dim must be a multiple of the (dtype-aware) packed
            # tile unless it equals the full dim.
            t0 = min(d0, max(step, _round_down(t0, step)))
        if pl.cdiv(d0, t0) == 1 and d0 > step:
            t0 = min(d0, _round_up(pl.cdiv(d0, 2), step))
        grid = (pl.cdiv(d0, t0),)
        block_shape = (t0, d1)
        index_map = lambda i: (i, 0)

    else:
        # ndim >= 3 (e.g. NCHW): 2-D grid over the two leading axes.  Minor
        # dims stay full-array so DMAs are contiguous and stores unmasked.
        d0, d1 = shape[0], shape[1]
        tail = math.prod(shape[2:])
        if d1 * tail <= budget_elems:
            t1 = d1
            t0 = min(d0, max(1, budget_elems // max(d1 * tail, 1)))
        else:
            t0 = 1
            t1 = min(d1, max(1, budget_elems // max(tail, 1)))
            # If a single (1, 1, *minor) slice still exceeds the budget we
            # accept it rather than tiling the (8,128)-constrained minor dims;
            # that only occurs for >2 MiB-per-channel spatial extents.
        if pl.cdiv(d0, t0) * pl.cdiv(d1, t1) == 1:
            # Whole array would fit one block: split so v7x's 2 TCs both work.
            if d0 >= 2:
                t0 = pl.cdiv(d0, 2)
            elif d1 >= 2:
                t1 = pl.cdiv(d1, 2)
        grid = (pl.cdiv(d0, t0), pl.cdiv(d1, t1))
        block_shape = (t0, t1) + tuple(shape[2:])
        trailing = (0,) * (ndim - 2)
        index_map = lambda i, j: (i, j) + trailing

    return pl.pallas_call(
        _zero_ablate_kernel,
        out_shape=jax.ShapeDtypeStruct(shape, dtype),
        grid_spec=pl.GridSpec(
            grid=grid,
            in_specs=[pl.BlockSpec(block_shape, index_map)],
            out_specs=pl.BlockSpec(block_shape, index_map),
        ),
        compiler_params=pltpu.CompilerParams(
            dimension_semantics=("parallel",) * len(grid),
            vmem_limit_bytes=_VMEM_LIMIT_BYTES,
        ),
    )(x)


def zero_ablation_forward(x, *, min_pallas_bytes=_SMALL_INPUT_BYTES):
    """Pallas TPU implementation of ZeroAblationWrapper.forward (y = x * 0.0).

    Accepts any shape/dtype, returns same shape/dtype, native layout.
    """
    dtype = x.dtype
    if x.ndim == 0 or x.size == 0:
        return x * jnp.zeros((), dtype)

    total_bytes = x.size * jnp.dtype(dtype).itemsize
    if total_bytes < min_pallas_bytes:
        # Tiny inputs: fused XLA elementwise beats pallas_call launch + DMA.
        return x * jnp.zeros((), dtype)

    # TODO(synk): with NCHW and W=16 each vreg carries only 16/128 valid lanes
    # and the (8,128)-tiled HBM layout pads W to 128 (~8x footprint). If the
    # surrounding graph can supply/consume a >=128-wide minor dim (e.g.
    # (N, C, H*W)), feed that layout in; we deliberately do NOT force a
    # relayout copy solely for this kernel.
    return _pallas_zero(x)


if __name__ == "__main__":
    key = jax.random.PRNGKey(0)
    # NCHW activation consistent with the module: (N=2, C=4, H=16, W=16).
    x = jax.random.normal(key, (2, 4, 16, 16), dtype=jnp.float32)

    # Default path: input is tiny (8 KiB), takes the fused-XLA fast path.
    y_fast = jax.block_until_ready(zero_ablation_forward(x))
    assert y_fast.shape == x.shape and y_fast.dtype == x.dtype
    assert bool(jnp.all(y_fast == 0.0))

    # Force the Pallas path on the same small input to exercise the kernel.
    y_pallas = jax.block_until_ready(zero_ablation_forward(x, min_pallas_bytes=0))
    assert y_pallas.shape == x.shape and y_pallas.dtype == x.dtype
    assert bool(jnp.all(y_pallas == 0.0))

    # Moderately larger NCHW input (512 KiB) exercising the tiled 2-D grid path.
    x2 = jax.random.normal(jax.random.PRNGKey(0), (2, 64, 16, 16), dtype=jnp.float32)
    y2 = jax.block_until_ready(zero_ablation_forward(x2))
    assert y2.shape == x2.shape and y2.dtype == x2.dtype
    assert bool(jnp.all(y2 == 0.0))

    print("KERNEL_OK")
</pallas_src>

<mosaic_0001>
module attributes {stable_mosaic.version = 11 : i64} {
  func.func @_zero_ablate_kernel(%arg0: i32, %arg1: i32, %arg2: memref<1x4x16x16xf32, #tpu.memory_space<vmem>>, %arg3: memref<1x4x16x16xf32, #tpu.memory_space<vmem>>) attributes {dimension_semantics = [#tpu.dimension_semantics<parallel>, #tpu.dimension_semantics<parallel>], iteration_bounds = array<i64: 2, 1>, scalar_prefetch = 0 : i64, scratch_operands = 0 : i64, tpu.core_type = #tpu.core_type<tc>, window_params = [{transform_indices = @transform_0, window_bounds = array<i64: 1, 4, 16, 16>}, {transform_indices = @transform_1, window_bounds = array<i64: 1, 4, 16, 16>}]} {
    %c0 = arith.constant 0 : index
    %c0_0 = arith.constant 0 : index
    %c0_1 = arith.constant 0 : index
    %c0_2 = arith.constant 0 : index
    %0 = vector.load %arg2[%c0, %c0_0, %c0_1, %c0_2] : memref<1x4x16x16xf32, #tpu.memory_space<vmem>>, vector<1x4x16x16xf32>
    %cst = arith.constant 0.000000e+00 : f32
    %1 = vector.broadcast %cst : f32 to vector<1x4x16x16xf32>
    %2 = arith.mulf %0, %1 : vector<1x4x16x16xf32>
    %c0_3 = arith.constant 0 : index
    %c0_4 = arith.constant 0 : index
    %c0_5 = arith.constant 0 : index
    %c0_6 = arith.constant 0 : index
    %3 = vector.load %arg3[%c0_3, %c0_4, %c0_5, %c0_6] : memref<1x4x16x16xf32, #tpu.memory_space<vmem>>, vector<1x4x16x16xf32>
    tpu.vector_store %arg3[%c0_3, %c0_4, %c0_5, %c0_6], %2 {strides = array<i32>} : memref<1x4x16x16xf32, #tpu.memory_space<vmem>>, vector<1x4x16x16xf32>,
    return
  }
  func.func @transform_0(%arg0: i32, %arg1: i32) -> (i32, i32, i32, i32) {
    %c0_i32 = arith.constant 0 : i32
    %c0_i32_0 = arith.constant 0 : i32
    %c0_i32_1 = arith.constant 0 : i32
    return %arg0, %arg1, %c0_i32, %c0_i32_0 : i32, i32, i32, i32
  }
  func.func @transform_1(%arg0: i32, %arg1: i32) -> (i32, i32, i32, i32) {
    %c0_i32 = arith.constant 0 : i32
    %c0_i32_0 = arith.constant 0 : i32
    %c0_i32_1 = arith.constant 0 : i32
    return %arg0, %arg1, %c0_i32, %c0_i32_0 : i32, i32, i32, i32
  }
}

</mosaic_0001>

<bundles_post_ra>
// kernel: tpu_custom_call.1
= control target key start
LH: loop header
LB: loop body
LE: loop exit
PB: predicated region body
PF: predicated region fallthrough
CT: control target
= control target key end

     0   :  { %6 = vsyncpa [#allocation3], 0  ;;  %s628_s0 = inlined_call_operand.hbm [shape: f32[2,4,16,16], index: 0, kind: input, shape index: {}]   ;;  %s629_s1 = inlined_call_operand.hbm [shape: f32[2,4,16,16], index: 1, kind: output, shape index: {}]  }
   0x1   :  { %8 = vsyncpa [#allocation3 + $0x1], 0 }
   0x2   :  { %9 = vsyncpa [#allocation4], 0 }
   0x3   :  { %11 = vsyncpa [#allocation4 + $0x1], 0  ;;  %s500_s6 = smov 0   ;;  %s502_s7 = smov 0  }
   0x4   :  { %s504_s8 = smov 0   ;;  %s506_s9 = smov 0  }
   0x5   :  { %s508_s10 = smov 0   ;;  %s510_s11 = smov 0  }
   0x6 LB: > { %s289_s12 = sadd.s32 4294967295, %s484_s11   ;;  %s290_s13 = sadd.s32 4294967294, %s484_s11   ;;  %s484_s11 = sphi %s510_s11, %s17_s11   ;;  %s480_s10 = sphi %s508_s10, %s638_s10   ;;  %s476_s9 = sphi %s506_s9, %s637_s9   ;;  %s472_s8 = sphi %s504_s8, %s636_s8   ;;  %s468_s7 = sphi %s502_s7, %s635_s7   ;;  %s464_s6 = sphi %s500_s6, %s634_s6  }
   0x7   : > { %s29_s14 = sadd.s32 1, %s480_s10  ;;  %s38_s15 = sadd.s32 1, %s472_s8 }
   0x8   : > { %p31_p0 = scmp.ge.s32.totalorder %s29_s14, 2  ;;  %p45_p1 = scmp.ne.s32.totalorder %s472_s8, %s468_s7 }
   0x9   : > { %p46_p2 = scmp.eq.s32.totalorder %s484_s11, 0  ;;  %p51_p3 = scmp.ne.s32.totalorder %s468_s7, %s464_s6 }
   0xa   : > { %s640_s14 = smov (%p31_p0, %s29_s14), 0  ;;  %p52_p5 = scmp.eq.s32.totalorder %s289_s12, 0 }
   0xb   : > { %p541_p4 = por %p46_p2, %p45_p1  ;;  %s33_s17 = ssub.s32 %s480_s10, %s640_s14 }
   0xc   : > { %p77_p6 = scmp.eq.s32.totalorder %s289_s12, 1  ;;  %p36_p7 = scmp.eq.s32.totalorder %s33_s17, 0 }
   0xd   : > { %p547_p8 = por %p52_p5, %p51_p3  ;;  %p83_p10 = scmp.eq.s32.totalorder %s290_s13, 1 }
   0xe   : > { %p551_p9 = por %p77_p6, %p45_p1  ;;  %p292_p12 = scmp.ge.s32.totalorder %s484_s11, 2 }
   0xf   : > { %s556_s20 = scalar_select %p36_p7, %s472_s8, %s38_s15  }
  0x10   : > { %p558_p11 = por %p83_p10, %p51_p3  ;;  %p318_p13 = scmp.lt.s32.totalorder %s484_s11, 2 }
  0x11   : > { %s103_s22 = sand.u32 1, %s472_s8   ;;  %s304_s24 = sshll.u32 %s480_s10, 6 }
  0x12   : > { %s293_s23 = sshll.u32 %s103_s22, 6  ;;  %s115_s27 = scalar_lea.hbm %s628_s0, %s304_s24 }
  0x13   : > { %s107_s28 = scalar_lea.vmem [#allocation2], %s293_s23  ;;  %s116_s30 = sshll.u32 %s115_s27, 4  ;;  %s117_s30 = int_to_ptr.hbm [resolvable:$true] %s116_s30 }
  0x14   : > { %s118_s29 = sshll.u32 %s107_s28, 4  ;;  %p311_p0 = pnand %p318_p13, %p541_p4  ;;  %s119_s29 = int_to_ptr.vmem [resolvable:$true] %s118_s29 }
  0x15   : > { %p296_p1 = scmp.ge.s32.totalorder %s484_s11, 1  ;;  %s104_s2 = scalar_lea.sflag [#allocation3], %s103_s22 }
  0x16   : > { %s486_s3 = smov 128   ;;  %s487_s4 = smov 8  }
  0x17   : > { %313 = dma.hbm_to_vmem [thread:$0]  (!%p311_p0), %s117_s30, 1024, %s119_s29, %s104_s2, %s486_s3, %s486_s3, %s487_s4  }
  0x18   : > { %p126_p2 = scmp.lt.s32.totalorder %s484_s11, 3 }
  0x1a   : > { %p127_p3 = pnand %p296_p1, %p126_p2 }
  0x1b   : > { %s574_s5 = sand.u32 (!%p127_p3), 1, %s468_s7  }
  0x1c   : > { %130 = sbr.rel (%p127_p3) target bundleno = 51 (0x33), region = 24  ;;  %s297_s12 = sshll.u32 (!%p127_p3), %s574_s5, 6 }
  0x1d   : > { %s133_s13 = scalar_lea.sflag (!%p127_p3), [#allocation3], %s574_s5  ;;  %s136_s15 = scalar_lea.vmem (!%p127_p3), [#allocation2], %s297_s12 }
  0x21   : > { %455 = dma.done.wait (%p547_p8), %s133_s13, 1024  }
  0x22   : > { %457 = vsyncadd (%p547_p8), %s133_s13, 4294966272  ;;  %s305_s16 = sshll.u32 %s476_s9, 6  ;;  %v158_v0 = vld [vmem:[%s136_s15] sm:$0xff]  ;;  %vm174_vm0 = vcmask 130048   ;;  %v159_v1 = vld [vmem:[%s136_s15 + $0x8] sm:$0xff]  ;;  %s155_s18 = scalar_lea.vmem [#allocation5], %s297_s12 }
  0x23   : > { %v160_v2 = vld [vmem:[%s136_s15 + $0x10] sm:$0xff]  ;;  %v166_v3 = vmul.f32 0.0, %v158_v0  ;;  %v167_v4 = vmul.f32 0.0, %v159_v1  ;;  %v161_v6 = vld [vmem:[%s136_s15 + $0x18] sm:$0xff]  ;;  %v162_v7 = vld [vmem:[%s136_s15 + $0x20] sm:$0xff]  ;;  %s198_s23 = scalar_lea.hbm %s629_s1, %s305_s16  ;;  %s199_s9 = sshll.u32 %s155_s18, 4  ;;  %s200_s9 = int_to_ptr.vmem [resolvable:$true] %s199_s9 }
  0x24   : > { %v168_v5 = vmul.f32 0.0, %v160_v2  ;;  %v163_v8 = vld [vmem:[%s136_s15 + $0x28] sm:$0xff]  ;;  %v169_v9 = vmul.f32 0.0, %v161_v6  ;;  %v164_v10 = vld [vmem:[%s136_s15 + $0x30] sm:$0xff]  ;;  %v170_v11 = vmul.f32 0.0, %v162_v7  ;;  %v165_v12 = vld [vmem:[%s136_s15 + $0x38] sm:$0xff] }
  0x25   : > { %175 = vst.msk [vmem:[%s155_s18] sm:$0xff] %vm174_vm0, %v166_v3  ;;  %v171_v13 = vmul.f32 0.0, %v163_v8  ;;  %v172_v14 = vmul.f32 0.0, %v164_v10  ;;  %s201_s24 = sshll.u32 %s198_s23, 4  ;;  %v173_v15 = vmul.f32 0.0, %v165_v12  ;;  %s184_s25 = scalar_lea.sflag [#allocation4], %s574_s5  ;;  %s202_s24 = int_to_ptr.hbm [resolvable:$true] %s201_s24 }
  0x26   : > { %176 = vst.msk [vmem:[%s155_s18 + $0x8] sm:$0xff] %vm174_vm0, %v167_v4  ;;  %s416_s26 = sshra.s32 %s202_s24, 4  ;;  %s422_s30 = scalar_lea.hbm %s629_s1, 128  ;;  %s417_s26 = int_to_ptr.hbm [resolvable:$true] %s416_s26 }
  0x27   : > { %177 = vst.msk [vmem:[%s155_s18 + $0x10] sm:$0xff] %vm174_vm0, %v168_v5  ;;  %s418_s27 = scalar_lea.hbm %s417_s26, 64  ;;  %p423_p7 = scmp.lt.s32.totalorder %s417_s26, %s629_s1 }
  0x28   : > { %178 = vst.msk [vmem:[%s155_s18 + $0x18] sm:$0xff] %vm174_vm0, %v169_v9  ;;  %p419_p4 = scmp.ne.s32.totalorder %s417_s26, %s418_s27  ;;  %p424_p8 = scmp.lt.s32.totalorder %s422_s30, %s418_s27 }
  0x29   : > { %179 = vst.msk [vmem:[%s155_s18 + $0x20] sm:$0xff] %vm174_vm0, %v170_v11 }
  0x2a   : > { %180 = vst.msk [vmem:[%s155_s18 + $0x28] sm:$0xff] %vm174_vm0, %v171_v13  ;;  %p420_p5 = pnand %p419_p4, %p551_p9  ;;  %p425_p10 = por %p424_p8, %p423_p7 }
  0x2b   : > { %181 = vst.msk [vmem:[%s155_s18 + $0x30] sm:$0xff] %vm174_vm0, %v172_v14 }
  0x2c   : > { %182 = vst.msk [vmem:[%s155_s18 + $0x38] sm:$0xff] %vm174_vm0, %v173_v15  ;;  %p421_p6 = pneg %p420_p5 }
  0x2e   : > { %p426_p13 = pnand %p425_p10, %p421_p6 }
  0x30   : > { %429 = shalt.err (!%p426_p13)
}
  0x31   : > { %s488_s4 = smov 128   ;;  %s489_s5 = smov 8  }
  0x32   : > { %308 = dma.vmem_to_hbm [thread:$0]  (%p551_p9), %s200_s9, 1024, %s202_s24, %s184_s25, %s488_s4, %s488_s4, %s489_s5  }
  0x33 PF: > { %s216_s12 = sand.u32 1, %s464_s6   ;;  %p315_p0 = pnand %p292_p12, %p558_p11 }
  0x34   : > { %s217_s13 = scalar_lea.sflag [#allocation4], %s216_s12 }
  0x35   : > { %p316_p1 = pneg %p315_p0 }
  0x37   : > { %459 = dma.done.wait (%p316_p1), %s217_s13, 1024  }
  0x38   : > { %461 = vsyncadd (%p316_p1), %s217_s13, 4294966272  ;;  %s17_s11 = sadd.s32 1, %s484_s11   ;;  %s634_s6 = smov %s468_s7 }
  0x39   : > { %p14_p2 = scmp.ge.s32.totalorder %s17_s11, 4   ;;  %s635_s7 = smov %s472_s8 }
  0x3a   : > { %s636_s8 = smov %s556_s20  ;;  %s637_s9 = smov %s480_s10 }
  0x3b   : > { %s638_s10 = smov %s640_s14  ;;  %16 = sbr.rel (!%p14_p2) target bundleno = 6 (0x6), region = 69 }
  0x40   :  { %223 = vsyncpa [#allocation3], 1 }
  0x41   :  { %225 = vsyncpa [#allocation3 + $0x1], 1 }
  0x42   :  { %226 = vsyncpa [#allocation4], 1 }
  0x43   :  { %228 = vsyncpa [#allocation4 + $0x1], 1 }

</bundles_post_ra>
